<compile_context>
chip_gen: v7x
topology: tpu7x:2x2x1
jax: 0.10.0
libtpu: 0.0.40
codegen_flags: <defaults>
</compile_context>

<pallas_src>
import jax
import jax.numpy as jnp
from jax.experimental import pallas as pl
from jax.experimental.pallas import tpu as pltpu

LANES = 128                # vreg lane width (last dim must be lane-dense)
SUBLANES = 8               # sublane granularity for f32 tiles
DEFAULT_TILE_ROWS = 2048   # 2048x128 f32 = 1 MiB per buffer


def _model_kernel(x_ref, w_ref, b_ref, o_ref):
    # x_ref / o_ref: (tile, 128) VMEM blocks.
    # w_ref / b_ref: (1, 1) SMEM scalars -> scalar read, VPU broadcasts.
    w = w_ref[0, 0]
    b = b_ref[0, 0]
    s = x_ref[...] * w + b
    # 20*sigmoid(s) + 31 == 10*tanh(0.5*s) + 41 : one EUP transcendental.
    o_ref[...] = 10.0 * jnp.tanh(0.5 * s) + 41.0


def _choose_tile(rows, tile_rows):
    """Sublane-aligned tile, >=2 grid steps when possible (v7x dual-TC)."""
    if rows <= SUBLANES:
        return rows                         # single full-extent block (tiny)
    half = ((pl.cdiv(rows, 2) + SUBLANES - 1) // SUBLANES) * SUBLANES
    tile = min(tile_rows, half)
    tile = max(SUBLANES, (tile // SUBLANES) * SUBLANES)
    return tile


def _run_slab(x2d, w, b, tile):
    rows = x2d.shape[0]
    grid = (pl.cdiv(rows, tile),)           # partial trailing block OK
    return pl.pallas_call(
        _model_kernel,
        out_shape=jax.ShapeDtypeStruct((rows, LANES), jnp.float32),
        grid=grid,
        in_specs=[
            pl.BlockSpec((tile, LANES), lambda i: (i, 0)),
            pl.BlockSpec(memory_space=pltpu.SMEM),   # w: (1,1) scalar in SMEM
            pl.BlockSpec(memory_space=pltpu.SMEM),   # b: (1,1) scalar in SMEM
        ],
        out_specs=pl.BlockSpec((tile, LANES), lambda i: (i, 0)),
        compiler_params=pltpu.CompilerParams(
            dimension_semantics=("parallel",),
            allow_input_fusion=[0],          # let XLA fuse reshape/pad producer
        ),
    )(x2d, w, b)


def model_forward(x, w, b, *, tile_rows=DEFAULT_TILE_ROWS):
    """x: (M, 1) f32, w: (1, 1) f32, b: (1, 1) f32 -> (M, 1) f32."""
    M, K = x.shape
    assert K == 1 and w.shape == (1, 1) and b.shape == (1, 1)

    x = x.astype(jnp.float32)
    w = w.astype(jnp.float32)
    b = b.astype(jnp.float32)

    rows = pl.cdiv(M, LANES)
    tile = _choose_tile(rows, tile_rows)

    if M % LANES == 0:
        # Zero-copy fast path: no pad, no trailing slice.
        x2d = x.reshape(rows, LANES)
        out2d = _run_slab(x2d, w, b, tile)
        return out2d.reshape(M, 1)

    # Ragged path: pad only the final partial 128-lane row.
    pad = rows * LANES - M
    x2d = jnp.pad(x.reshape(-1), (0, pad)).reshape(rows, LANES)
    out2d = _run_slab(x2d, w, b, tile)
    return out2d.reshape(-1)[:M].reshape(M, 1)


if __name__ == "__main__":
    key = jax.random.PRNGKey(0)
    k1, k2, k3, k4, k5 = jax.random.split(key, 5)

    def ref_fn(x, w, b):
        return 20.0 * jax.nn.sigmoid(x @ w + b) + 31.0

    # Parameters exactly as the module's __init__ (both zero) ...
    w0 = jnp.zeros((1, 1), dtype=jnp.float32)
    b0 = jnp.zeros((1, 1), dtype=jnp.float32)
    # ... and non-trivial values to exercise the scale/bias math.
    w1 = jax.random.normal(k4, (1, 1), dtype=jnp.float32)
    b1 = jax.random.normal(k5, (1, 1), dtype=jnp.float32)

    cases = [
        (8,    w0, b0, k1),   # tiny input, ragged path, single full-extent block
        (300,  w1, b1, k2),   # ragged path (pads only last partial lane row)
        (3072, w1, b1, k3),   # M % 128 == 0 -> zero-copy path, partial last tile
    ]
    for M, wp, bp, kk in cases:
        x = jax.random.normal(kk, (M, 1), dtype=jnp.float32)
        out = jax.block_until_ready(model_forward(x, wp, bp))
        assert out.shape == (M, 1)
        assert jnp.allclose(out, ref_fn(x, wp, bp), atol=1e-4, rtol=1e-5)

    print("KERNEL_OK")
</pallas_src>

<mosaic_0001>
module attributes {stable_mosaic.version = 11 : i64} {
  func.func @_model_kernel(%arg0: i32, %arg1: memref<1x128xf32, #tpu.memory_space<vmem>>, %arg2: memref<1x1xf32, #tpu.memory_space<smem>>, %arg3: memref<1x1xf32, #tpu.memory_space<smem>>, %arg4: memref<1x128xf32, #tpu.memory_space<vmem>>) attributes {dimension_semantics = [#tpu.dimension_semantics<parallel>], iteration_bounds = array<i64: 1>, scalar_prefetch = 0 : i64, scratch_operands = 0 : i64, tpu.core_type = #tpu.core_type<tc>, window_params = [{transform_indices = @transform_0, window_bounds = array<i64: 1, 128>}, {transform_indices = @transform_1, window_bounds = array<i64: 1, 1>}, {transform_indices = @transform_2, window_bounds = array<i64: 1, 1>}, {transform_indices = @transform_3, window_bounds = array<i64: 1, 128>}]} {
    %c0 = arith.constant 0 : index
    %c0_0 = arith.constant 0 : index
    %0 = memref.load %arg2[%c0, %c0_0] : memref<1x1xf32, #tpu.memory_space<smem>>
    %c0_1 = arith.constant 0 : index
    %c0_2 = arith.constant 0 : index
    %1 = memref.load %arg3[%c0_1, %c0_2] : memref<1x1xf32, #tpu.memory_space<smem>>
    %c0_3 = arith.constant 0 : index
    %c0_4 = arith.constant 0 : index
    %2 = vector.load %arg1[%c0_3, %c0_4] : memref<1x128xf32, #tpu.memory_space<vmem>>, vector<1x128xf32>
    %3 = vector.broadcast %0 : f32 to vector<1x128xf32>
    %4 = arith.mulf %2, %3 : vector<1x128xf32>
    %5 = vector.broadcast %1 : f32 to vector<1x128xf32>
    %6 = arith.addf %4, %5 : vector<1x128xf32>
    %cst = arith.constant 5.000000e-01 : f32
    %7 = vector.broadcast %cst : f32 to vector<1x128xf32>
    %8 = arith.mulf %7, %6 : vector<1x128xf32>
    %9 = math.tanh %8 : vector<1x128xf32>
    %cst_5 = arith.constant 1.000000e+01 : f32
    %10 = vector.broadcast %cst_5 : f32 to vector<1x128xf32>
    %11 = arith.mulf %10, %9 : vector<1x128xf32>
    %cst_6 = arith.constant 4.100000e+01 : f32
    %12 = vector.broadcast %cst_6 : f32 to vector<1x128xf32>
    %13 = arith.addf %11, %12 : vector<1x128xf32>
    %c0_7 = arith.constant 0 : index
    %c0_8 = arith.constant 0 : index
    %14 = vector.load %arg4[%c0_7, %c0_8] : memref<1x128xf32, #tpu.memory_space<vmem>>, vector<1x128xf32>
    tpu.vector_store %arg4[%c0_7, %c0_8], %13 {strides = array<i32>} : memref<1x128xf32, #tpu.memory_space<vmem>>, vector<1x128xf32>,
    return
  }
  func.func @transform_0(%arg0: i32) -> (i32, i32) {
    %c0_i32 = arith.constant 0 : i32
    %c0_i32_0 = arith.constant 0 : i32
    return %arg0, %c0_i32 : i32, i32
  }
  func.func @transform_1(%arg0: i32) -> (i32, i32) {
    %c0_i32 = arith.constant 0 : i32
    %c0_i32_0 = arith.constant 0 : i32
    %c0_i32_1 = arith.constant 0 : i32
    return %c0_i32, %c0_i32_0 : i32, i32
  }
  func.func @transform_2(%arg0: i32) -> (i32, i32) {
    %c0_i32 = arith.constant 0 : i32
    %c0_i32_0 = arith.constant 0 : i32
    %c0_i32_1 = arith.constant 0 : i32
    return %c0_i32, %c0_i32_0 : i32, i32
  }
  func.func @transform_3(%arg0: i32) -> (i32, i32) {
    %c0_i32 = arith.constant 0 : i32
    %c0_i32_0 = arith.constant 0 : i32
    return %arg0, %c0_i32 : i32, i32
  }
}

</mosaic_0001>

<bundles_post_ra>
// kernel: tpu_custom_call.1
= control target key start
LH: loop header
LB: loop body
LE: loop exit
PB: predicated region body
PF: predicated region fallthrough
CT: control target
= control target key end

     0   :  { %s112_s0 = inlined_call_operand.vmem [shape: f32[1,128], index: 0, kind: input, shape index: {}]   ;;  %s113_s1 = inlined_call_operand.<no memory space> [shape: f32[1,1], index: 1, kind: input, shape index: {}]   ;;  %s114_s2 = inlined_call_operand.<no memory space> [shape: f32[1,1], index: 2, kind: input, shape index: {}]   ;;  %s115_s3 = inlined_call_operand.hbm [shape: f32[1,128], index: 3, kind: output, shape index: {}]  }
   0x1   :  { %v19_v0 = vld [vmem:[%s112_s0] sm:$0x1]  ;;  %v20_v1 = vstv %s113_s1  ;;  %v22_v2 = vstv %s114_s2 }
   0x2   :  { %10 = vsyncpa [#allocation5], 0  ;;  %v21_v3 = vmul.f32 %v20_v1, %v19_v0  ;;  %s70_s18 = smov [#allocation4]  }
   0x3   :  { %s35_s19 = sshll.u32 %s70_s18, 4  ;;  %s36_s19 = int_to_ptr.vmem [resolvable:$true] %s35_s19 }
   0x4   :  { %v23_v4 = vadd.f32 %v22_v2, %v21_v3  ;;  %s46_s0 = scalar_lea.vmem %s36_s19, 16  ;;  %s50_s20 = scalar_lea.vmem %s36_s19, 32 }
   0x5   :  { %p47_p0 = scmp.ne.s32.totalorder %s36_s19, %s46_s0  ;;  %p51_p1 = scmp.lt.s32.totalorder %s36_s19, %s36_s19 }
   0x6   :  { %v24_v5 = vmul.f32 0.5, %v23_v4  ;;  %p52_p2 = scmp.lt.s32.totalorder %s50_s20, %s46_s0 }
   0x8   :  { %44 = vtanh.f32 %v24_v5  ;;  %p53_p3 = por %p52_p2, %p51_p1 }
   0xa   :  { %p54_p4 = pnand %p53_p3, %p47_p0 }
  0x12   :  { %v45_v6 = vpop.eup %44 }
  0x13   :  { %v26_v7 = vmul.f32 10.0, %v45_v6 }
  0x15   :  { %v27_v8 = vadd.f32 41.0, %v26_v7 }
  0x17   :  { %28 = vst [vmem:[#allocation4] sm:$0x1] %v27_v8 }
  0x18   :  { %57 = shalt.err (!%p54_p4)
}
  0x19   :  { %s58_s21 = scalar_lea.hbm %s115_s3, 16 }
  0x1a   :  { %p59_p5 = scmp.ne.s32.totalorder %s115_s3, %s58_s21  ;;  %p62_p6 = scmp.lt.u32.totalorder %s58_s21, %s115_s3 }
  0x1c   :  { %p64_p7 = pnand %p62_p6, %p59_p5 }
  0x1e   :  { %67 = shalt.err (!%p64_p7)
}
  0x1f   :  { %38 = dma.vmem_to_hbm [thread:$0]  %s36_s19, 16, %s115_s3, [#allocation5]  }
  0x20   :  { %68 = dma.done.wait [#allocation5], 16  }
  0x21   :  { %69 = vsyncadd [#allocation5], 4294967280 }
  0x22   :  { %42 = vsyncpa [#allocation5], 1 }

</bundles_post_ra>
